<compile_context>
chip_gen: v7x
topology: tpu7x:2x2x1
jax: 0.10.0
libtpu: 0.0.40
codegen_flags: <defaults>
</compile_context>

<pallas_src>
import functools

import jax
import jax.numpy as jnp
from jax import lax
from jax.experimental import pallas as pl
from jax.experimental.pallas import tpu as pltpu

_NEG_BIG = -1e30  # finite "minus infinity" so exp()/max() never produce NaN


def cl_kernel(h1_ref, h2t_ref, w_ref, lab_ref,
              ce_ref, bal_ref, sq_ref,
              m_sc, l_sc, t_sc,
              *, n_total, m_total, tm):
    """One (row-tile, m-tile) step of CE(h1 @ h2.T / bit / 0.3, targets) + reg parts."""
    i = pl.program_id(0)   # row-tile index (parallel)
    j = pl.program_id(1)   # m-tile index  (arbitrary, innermost)

    @pl.when(j == 0)
    def _init():
        m_sc[...] = jnp.full_like(m_sc, _NEG_BIG)   # running row max
        l_sc[...] = jnp.zeros_like(l_sc)            # running softmax denominator
        t_sc[...] = jnp.zeros_like(t_sc)            # selected target logit

    h1 = h1_ref[...]                                  # (tn, K) f32, un-scaled
    tn = h1.shape[0]

    # logits tile = (h1 @ h2.T) / bit / 0.3 -- scale folded into h2t (bf16 operands,
    # f32 MXU accumulation; all softmax math stays f32).
    logits = jnp.dot(h1.astype(jnp.bfloat16), h2t_ref[...],
                     preferred_element_type=jnp.float32)          # (tn, tm)

    # Mask lane-padded columns (>= m_total) out of the log-sum-exp.
    col_ids = j * tm + lax.broadcasted_iota(jnp.int32, logits.shape, 1)
    col_valid = col_ids < m_total
    masked = jnp.where(col_valid, logits, _NEG_BIG)

    # targets = where(labels == 0, 0, weighted).long()
    w = w_ref[...]                         # (tn, 1) f32
    lab = lab_ref[...]                     # (tn, 1) i32
    targets = jnp.where(lab == 0, jnp.zeros_like(w), w).astype(jnp.int32)

    # Online (flash-style) softmax update for this m tile.
    m_prev = m_sc[...]
    m_new = jnp.maximum(m_prev, jnp.max(masked, axis=-1, keepdims=True))
    alpha = jnp.exp(m_prev - m_new)
    p = jnp.where(col_valid, jnp.exp(masked - m_new), 0.0)
    l_sc[...] = alpha * l_sc[...] + jnp.sum(p, axis=-1, keepdims=True)
    m_sc[...] = m_new

    # Target logit: exactly one m tile contains the target column.
    # TODO(synk): like torch's CrossEntropyLoss/take_along_axis, a target index
    # >= M silently contributes 0 here.
    t_sc[...] = t_sc[...] + jnp.sum(
        jnp.where(col_ids == targets, logits, 0.0), axis=-1, keepdims=True)

    @pl.when(j == pl.num_programs(1) - 1)
    def _finalize():
        # Row-validity mask: rows >= n_total are zero padding (excluded from CE).
        row_ids = i * tn + lax.broadcasted_iota(jnp.int32, (tn, 1), 0)
        row_valid = row_ids < n_total
        lse = m_sc[...] + jnp.log(l_sc[...])                       # (tn, 1)
        ce_ref[0, 0] = jnp.sum(jnp.where(row_valid, lse - t_sc[...], 0.0))
        # Padded rows of h1 are zero -> no-op for the reg accumulators.
        bal_ref[...] = jnp.sum(h1, axis=0, keepdims=True)          # (1, K)
        sq_ref[0, 0] = jnp.sum(h1 * h1)


def _round_up(x, m):
    return (x + m - 1) // m * m


def _vmem_limit_bytes():
    """Generation-aware scoped-VMEM budget (~75% of physical, capped)."""
    try:
        cap = pltpu.get_tpu_info().vmem_capacity_bytes
        return int(min(cap * 3 // 4, 96 * 1024 * 1024))
    except Exception:
        return 48 * 1024 * 1024  # safe on v5e/v6e (128 MiB) and v7x (64 MiB)


def cl_loss(h1, h2, weighted, labels, bit, *, block_n=256, block_m=512):
    """Pallas implementation of CL.forward (returns a scalar loss)."""
    h1 = h1.astype(jnp.float32)
    n, k = h1.shape
    m = h2.shape[0]

    # Row tile (multiple of 8 sublanes) and lane-dense m tile (multiple of 128).
    tn = min(block_n, _round_up(n, 8))
    n_pad = _round_up(n, tn)
    m_128 = _round_up(m, 128)
    tm = min(_round_up(block_m, 128), m_128)
    m_pad = _round_up(m, tm)
    n_tiles = n_pad // tn
    m_tiles = m_pad // tm

    w1 = weighted.astype(jnp.float32)
    lab1 = labels.astype(jnp.int32)
    if n_pad != n:
        h1 = jnp.pad(h1, ((0, n_pad - n), (0, 0)))
        w1 = jnp.pad(w1, (0, n_pad - n))
        lab1 = jnp.pad(lab1, (0, n_pad - n))
    w2 = w1.reshape(n_pad, 1)
    lab2 = lab1.reshape(n_pad, 1)

    # Fold the two divides into one multiply applied to h2 (only used by the
    # matmul), pre-transpose to [K, M], cast to bf16, lane-pad M to the tile.
    scale = 1.0 / (float(bit) * 0.3)
    h2t = (h2.astype(jnp.float32) * scale).T.astype(jnp.bfloat16)   # (K, M)
    if m_pad != m:
        h2t = jnp.pad(h2t, ((0, 0), (0, m_pad - m)))

    kernel = functools.partial(cl_kernel, n_total=n, m_total=m, tm=tm)

    ce_part, bal_part, sq_part = pl.pallas_call(
        kernel,
        out_shape=(
            jax.ShapeDtypeStruct((n_tiles, 1), jnp.float32),   # per-tile CE sum
            jax.ShapeDtypeStruct((n_tiles, k), jnp.float32),   # per-tile sum(h1, 0)
            jax.ShapeDtypeStruct((n_tiles, 1), jnp.float32),   # per-tile sum(h1*h1)
        ),
        grid=(n_tiles, m_tiles),
        in_specs=[
            # h1 row tile: invariant in the m axis -> no re-DMA per m step.
            pl.BlockSpec((tn, k), lambda i, j: (i, 0)),
            # h2t (K, tm) slab streamed over the inner m axis (double-buffered).
            pl.BlockSpec((k, tm), lambda i, j: (0, j)),
            pl.BlockSpec((tn, 1), lambda i, j: (i, 0)),        # weighted column
            pl.BlockSpec((tn, 1), lambda i, j: (i, 0)),        # labels column
        ],
        out_specs=(
            pl.BlockSpec((1, 1), lambda i, j: (i, 0), memory_space=pltpu.SMEM),
            pl.BlockSpec((1, k), lambda i, j: (i, 0)),
            pl.BlockSpec((1, 1), lambda i, j: (i, 0), memory_space=pltpu.SMEM),
        ),
        scratch_shapes=[
            pltpu.VMEM((tn, 1), jnp.float32),   # running row max
            pltpu.VMEM((tn, 1), jnp.float32),   # running denominator
            pltpu.VMEM((tn, 1), jnp.float32),   # target logit
        ],
        compiler_params=pltpu.CompilerParams(
            # Row tiles are independent (shardable across v7x's 2 TCs); the inner
            # m axis carries the online-softmax accumulators -> arbitrary.
            dimension_semantics=("parallel", "arbitrary"),
            vmem_limit_bytes=_vmem_limit_bytes(),
        ),
        cost_estimate=pl.CostEstimate(
            flops=2 * n_pad * m_pad * k,
            transcendentals=n_pad * m_pad,
            bytes_accessed=n_pad * k * 4 + k * m_pad * 2 + n_pad * 8
                           + n_tiles * (k + 2) * 4,
        ),
    )(h1, h2t, w2, lab2)

    # Tiny final reduction + reg term in plain JAX.
    ce = jnp.sum(ce_part) / n
    balance = jnp.sum(bal_part, axis=0) / n                 # (K,)
    reg = jnp.mean(balance * balance) - jnp.sum(sq_part) / (n * k)
    return ce + reg


def cl_loss_ref(h1, h2, weighted, labels, bit):
    """Pure-JAX f32 reference replicating the PyTorch forward."""
    logits = jnp.einsum('ik,jk->ij', h1, h2) / bit / 0.3
    balance = jnp.sum(h1, axis=0) / h1.shape[0]
    reg = jnp.mean(balance ** 2) - jnp.mean(h1 ** 2)
    targets = jnp.where(labels == 0, jnp.zeros_like(weighted),
                        weighted).astype(jnp.int32)
    logp = jax.nn.log_softmax(logits, axis=-1)
    ce = -jnp.mean(jnp.take_along_axis(logp, targets[:, None], axis=-1))
    return ce + reg


if __name__ == "__main__":
    key = jax.random.PRNGKey(0)
    keys = jax.random.split(key, 12)
    bit = 32  # self.bit

    # Test 1: tiny shapes (single row tile, single m tile, lane-padded M).
    N, M, K = 8, 8, 32
    h1 = jax.random.normal(keys[0], (N, K), dtype=jnp.float32)
    h2 = jax.random.normal(keys[1], (M, K), dtype=jnp.float32)
    weighted = jax.random.randint(keys[2], (N,), 0, M).astype(jnp.float32)
    labels = jax.random.randint(keys[3], (N,), 0, 3).astype(jnp.int32)

    loss = cl_loss(h1, h2, weighted, labels, bit)
    jax.block_until_ready(loss)
    ref = cl_loss_ref(h1, h2, weighted, labels, bit)
    # bf16 MXU operands -> relaxed tolerance vs the f32 reference.
    assert jnp.isfinite(loss), loss
    assert jnp.allclose(loss, ref, rtol=2e-2, atol=2e-2), (loss, ref)

    # Test 2: ragged N exercising the multi-row-tile grid + row-mask path.
    N2, M2 = 20, 16
    h1b = jax.random.normal(keys[4], (N2, K), dtype=jnp.float32)
    h2b = jax.random.normal(keys[5], (M2, K), dtype=jnp.float32)
    weightedb = jax.random.randint(keys[6], (N2,), 0, M2).astype(jnp.float32)
    labelsb = jax.random.randint(keys[7], (N2,), 0, 3).astype(jnp.int32)

    loss2 = cl_loss(h1b, h2b, weightedb, labelsb, bit, block_n=8)  # 3 row tiles
    jax.block_until_ready(loss2)
    ref2 = cl_loss_ref(h1b, h2b, weightedb, labelsb, bit)
    assert jnp.isfinite(loss2), loss2
    assert jnp.allclose(loss2, ref2, rtol=2e-2, atol=2e-2), (loss2, ref2)

    # Test 3: ragged M exercising the online-softmax m-tiling (3 m tiles).
    N3, M3 = 16, 300
    h1c = jax.random.normal(keys[8], (N3, K), dtype=jnp.float32)
    h2c = jax.random.normal(keys[9], (M3, K), dtype=jnp.float32)
    weightedc = jax.random.randint(keys[10], (N3,), 0, M3).astype(jnp.float32)
    labelsc = jax.random.randint(keys[11], (N3,), 0, 3).astype(jnp.int32)

    loss3 = cl_loss(h1c, h2c, weightedc, labelsc, bit, block_n=8, block_m=128)
    jax.block_until_ready(loss3)
    ref3 = cl_loss_ref(h1c, h2c, weightedc, labelsc, bit)
    assert jnp.isfinite(loss3), loss3
    assert jnp.allclose(loss3, ref3, rtol=2e-2, atol=2e-2), (loss3, ref3)

    print("KERNEL_OK")
</pallas_src>

<mosaic_0001>
module attributes {stable_mosaic.version = 11 : i64} {
  func.func @cl_kernel(%arg0: i32, %arg1: i32, %arg2: memref<8x32xf32, #tpu.memory_space<vmem>>, %arg3: memref<32x128xbf16, #tpu.memory_space<vmem>>, %arg4: memref<8x1xf32, #tpu.memory_space<vmem>>, %arg5: memref<8x1xi32, #tpu.memory_space<vmem>>, %arg6: memref<1x1xf32, #tpu.memory_space<smem>>, %arg7: memref<1x32xf32, #tpu.memory_space<vmem>>, %arg8: memref<1x1xf32, #tpu.memory_space<smem>>, %arg9: memref<8x1xf32, #tpu.memory_space<vmem>>, %arg10: memref<8x1xf32, #tpu.memory_space<vmem>>, %arg11: memref<8x1xf32, #tpu.memory_space<vmem>>) attributes {dimension_semantics = [#tpu.dimension_semantics<parallel>, #tpu.dimension_semantics<arbitrary>], iteration_bounds = array<i64: 1, 1>, scalar_prefetch = 0 : i64, scratch_operands = 3 : i64, tpu.core_type = #tpu.core_type<tc>, window_params = [{transform_indices = @transform_0, window_bounds = array<i64: 8, 32>}, {transform_indices = @transform_1, window_bounds = array<i64: 32, 128>}, {transform_indices = @transform_2, window_bounds = array<i64: 8, 1>}, {transform_indices = @transform_3, window_bounds = array<i64: 8, 1>}, {transform_indices = @transform_4, window_bounds = array<i64: 1, 1>}, {transform_indices = @transform_5, window_bounds = array<i64: 1, 32>}, {transform_indices = @transform_6, window_bounds = array<i64: 1, 1>}]} {
    %c0_i32 = arith.constant 0 : i32
    %0 = arith.cmpi eq, %arg1, %c0_i32 : i32
    %1 = arith.extui %0 : i1 to i32
    %c0_i32_0 = arith.constant 0 : i32
    %2 = arith.cmpi ne, %1, %c0_i32_0 : i32
    scf.if %2 {
      %cst_30 = arith.constant -1.000000e+30 : f32
      %52 = vector.broadcast %cst_30 : f32 to vector<8x1xf32>
      %c0_31 = arith.constant 0 : index
      %c0_32 = arith.constant 0 : index
      %53 = vector.load %arg9[%c0_31, %c0_32] : memref<8x1xf32, #tpu.memory_space<vmem>>, vector<8x1xf32>
      tpu.vector_store %arg9[%c0_31, %c0_32], %52 {strides = array<i32>} : memref<8x1xf32, #tpu.memory_space<vmem>>, vector<8x1xf32>,
      %cst_33 = arith.constant 0.000000e+00 : f32
      %54 = vector.broadcast %cst_33 : f32 to vector<8x1xf32>
      %c0_34 = arith.constant 0 : index
      %c0_35 = arith.constant 0 : index
      %55 = vector.load %arg10[%c0_34, %c0_35] : memref<8x1xf32, #tpu.memory_space<vmem>>, vector<8x1xf32>
      tpu.vector_store %arg10[%c0_34, %c0_35], %54 {strides = array<i32>} : memref<8x1xf32, #tpu.memory_space<vmem>>, vector<8x1xf32>,
      %cst_36 = arith.constant 0.000000e+00 : f32
      %56 = vector.broadcast %cst_36 : f32 to vector<8x1xf32>
      %c0_37 = arith.constant 0 : index
      %c0_38 = arith.constant 0 : index
      %57 = vector.load %arg11[%c0_37, %c0_38] : memref<8x1xf32, #tpu.memory_space<vmem>>, vector<8x1xf32>
      tpu.vector_store %arg11[%c0_37, %c0_38], %56 {strides = array<i32>} : memref<8x1xf32, #tpu.memory_space<vmem>>, vector<8x1xf32>,
    } else {
    }
    %c0 = arith.constant 0 : index
    %c0_1 = arith.constant 0 : index
    %3 = vector.load %arg2[%c0, %c0_1] : memref<8x32xf32, #tpu.memory_space<vmem>>, vector<8x32xf32>
    %4 = arith.truncf %3 : vector<8x32xf32> to vector<8x32xbf16>
    %c0_2 = arith.constant 0 : index
    %c0_3 = arith.constant 0 : index
    %5 = vector.load %arg3[%c0_2, %c0_3] : memref<32x128xbf16, #tpu.memory_space<vmem>>, vector<32x128xbf16>
    %cst = arith.constant dense<0.000000e+00> : vector<8x128xf32>
    %6 = tpu.matmul %4, %5, %cst {dimension_numbers = #tpu.dot_dimension_numbers<[1], [0], [0], [1], [0, 0, 1, 1], [], []>} : vector<8x32xbf16>, vector<32x128xbf16>, vector<8x128xf32> -> vector<8x128xf32>
    %c128_i32 = arith.constant 128 : i32
    %7 = arith.muli %arg1, %c128_i32 : i32
    %8 = tpu.iota {dimensions = array<i32: 1>} : vector<8x128xi32>
    %9 = vector.broadcast %7 : i32 to vector<8x128xi32>
    %10 = arith.addi %9, %8 : vector<8x128xi32>
    %c8_i32 = arith.constant 8 : i32
    %11 = vector.broadcast %c8_i32 : i32 to vector<8x128xi32>
    %12 = arith.cmpi slt, %10, %11 : vector<8x128xi32>
    %cst_4 = arith.constant -1.000000e+30 : f32
    %13 = vector.broadcast %cst_4 : f32 to vector<8x128xf32>
    %14 = arith.select %12, %6, %13 : vector<8x128xi1>, vector<8x128xf32>
    %c0_5 = arith.constant 0 : index
    %c0_6 = arith.constant 0 : index
    %15 = vector.load %arg4[%c0_5, %c0_6] : memref<8x1xf32, #tpu.memory_space<vmem>>, vector<8x1xf32>
    %c0_7 = arith.constant 0 : index
    %c0_8 = arith.constant 0 : index
    %16 = vector.load %arg5[%c0_7, %c0_8] : memref<8x1xi32, #tpu.memory_space<vmem>>, vector<8x1xi32>
    %c0_i32_9 = arith.constant 0 : i32
    %17 = vector.broadcast %c0_i32_9 : i32 to vector<8x1xi32>
    %18 = arith.cmpi eq, %16, %17 : vector<8x1xi32>
    %cst_10 = arith.constant 0.000000e+00 : f32
    %19 = vector.broadcast %cst_10 : f32 to vector<8x1xf32>
    %20 = arith.select %18, %19, %15 : vector<8x1xi1>, vector<8x1xf32>
    %21 = arith.fptosi %20 : vector<8x1xf32> to vector<8x1xi32>
    %c0_11 = arith.constant 0 : index
    %c0_12 = arith.constant 0 : index
    %22 = vector.load %arg9[%c0_11, %c0_12] : memref<8x1xf32, #tpu.memory_space<vmem>>, vector<8x1xf32>
    %cst_13 = arith.constant dense<0xFF800000> : vector<8xf32>
    %23 = vector.multi_reduction <maximumf>, %14, %cst_13 [1] : vector<8x128xf32> to vector<8xf32>
    %24 = vector.shape_cast %23 : vector<8xf32> to vector<8x1xf32>
    %25 = arith.maximumf %22, %24 : vector<8x1xf32>
    %26 = arith.subf %22, %25 : vector<8x1xf32>
    %27 = math.exp %26 : vector<8x1xf32>
    %28 = vector.broadcast %25 : vector<8x1xf32> to vector<8x128xf32>
    %29 = arith.subf %14, %28 : vector<8x128xf32>
    %30 = math.exp %29 : vector<8x128xf32>
    %cst_14 = arith.constant 0.000000e+00 : f32
    %31 = vector.broadcast %cst_14 : f32 to vector<8x128xf32>
    %32 = arith.select %12, %30, %31 : vector<8x128xi1>, vector<8x128xf32>
    %c0_15 = arith.constant 0 : index
    %c0_16 = arith.constant 0 : index
    %33 = vector.load %arg10[%c0_15, %c0_16] : memref<8x1xf32, #tpu.memory_space<vmem>>, vector<8x1xf32>
    %34 = arith.mulf %27, %33 : vector<8x1xf32>
    %cst_17 = arith.constant dense<0.000000e+00> : vector<8xf32>
    %35 = vector.multi_reduction <add>, %32, %cst_17 [1] : vector<8x128xf32> to vector<8xf32>
    %36 = vector.shape_cast %35 : vector<8xf32> to vector<8x1xf32>
    %37 = arith.addf %34, %36 : vector<8x1xf32>
    %c0_18 = arith.constant 0 : index
    %c0_19 = arith.constant 0 : index
    %38 = vector.load %arg10[%c0_18, %c0_19] : memref<8x1xf32, #tpu.memory_space<vmem>>, vector<8x1xf32>
    tpu.vector_store %arg10[%c0_18, %c0_19], %37 {strides = array<i32>} : memref<8x1xf32, #tpu.memory_space<vmem>>, vector<8x1xf32>,
    %c0_20 = arith.constant 0 : index
    %c0_21 = arith.constant 0 : index
    %39 = vector.load %arg9[%c0_20, %c0_21] : memref<8x1xf32, #tpu.memory_space<vmem>>, vector<8x1xf32>
    tpu.vector_store %arg9[%c0_20, %c0_21], %25 {strides = array<i32>} : memref<8x1xf32, #tpu.memory_space<vmem>>, vector<8x1xf32>,
    %c0_22 = arith.constant 0 : index
    %c0_23 = arith.constant 0 : index
    %40 = vector.load %arg11[%c0_22, %c0_23] : memref<8x1xf32, #tpu.memory_space<vmem>>, vector<8x1xf32>
    %41 = vector.broadcast %21 : vector<8x1xi32> to vector<8x128xi32>
    %42 = arith.cmpi eq, %10, %41 : vector<8x128xi32>
    %cst_24 = arith.constant 0.000000e+00 : f32
    %43 = vector.broadcast %cst_24 : f32 to vector<8x128xf32>
    %44 = arith.select %42, %6, %43 : vector<8x128xi1>, vector<8x128xf32>
    %cst_25 = arith.constant dense<0.000000e+00> : vector<8xf32>
    %45 = vector.multi_reduction <add>, %44, %cst_25 [1] : vector<8x128xf32> to vector<8xf32>
    %46 = vector.shape_cast %45 : vector<8xf32> to vector<8x1xf32>
    %47 = arith.addf %40, %46 : vector<8x1xf32>
    %c0_26 = arith.constant 0 : index
    %c0_27 = arith.constant 0 : index
    %48 = vector.load %arg11[%c0_26, %c0_27] : memref<8x1xf32, #tpu.memory_space<vmem>>, vector<8x1xf32>
    tpu.vector_store %arg11[%c0_26, %c0_27], %47 {strides = array<i32>} : memref<8x1xf32, #tpu.memory_space<vmem>>, vector<8x1xf32>,
    %c0_i32_28 = arith.constant 0 : i32
    %49 = arith.cmpi eq, %arg1, %c0_i32_28 : i32
    %50 = arith.extui %49 : i1 to i32
    %c0_i32_29 = arith.constant 0 : i32
    %51 = arith.cmpi ne, %50, %c0_i32_29 : i32
    scf.if %51 {
      %c8_i32_30 = arith.constant 8 : i32
      %52 = arith.muli %arg0, %c8_i32_30 : i32
      %53 = tpu.iota {dimensions = array<i32: 0>} : vector<8x1xi32>
      %54 = vector.broadcast %52 : i32 to vector<8x1xi32>
      %55 = arith.addi %54, %53 : vector<8x1xi32>
      %c8_i32_31 = arith.constant 8 : i32
      %56 = vector.broadcast %c8_i32_31 : i32 to vector<8x1xi32>
      %57 = arith.cmpi slt, %55, %56 : vector<8x1xi32>
      %c0_32 = arith.constant 0 : index
      %c0_33 = arith.constant 0 : index
      %58 = vector.load %arg9[%c0_32, %c0_33] : memref<8x1xf32, #tpu.memory_space<vmem>>, vector<8x1xf32>
      %c0_34 = arith.constant 0 : index
      %c0_35 = arith.constant 0 : index
      %59 = vector.load %arg10[%c0_34, %c0_35] : memref<8x1xf32, #tpu.memory_space<vmem>>, vector<8x1xf32>
      %60 = math.log %59 : vector<8x1xf32>
      %61 = arith.addf %58, %60 : vector<8x1xf32>
      %c0_36 = arith.constant 0 : index
      %c0_37 = arith.constant 0 : index
      %62 = vector.load %arg11[%c0_36, %c0_37] : memref<8x1xf32, #tpu.memory_space<vmem>>, vector<8x1xf32>
      %63 = arith.subf %61, %62 : vector<8x1xf32>
      %cst_38 = arith.constant 0.000000e+00 : f32
      %64 = vector.broadcast %cst_38 : f32 to vector<8x1xf32>
      %65 = arith.select %57, %63, %64 : vector<8x1xi1>, vector<8x1xf32>
      %66 = vector.shape_cast %65 : vector<8x1xf32> to vector<1x8x1xf32>
      %cst_39 = arith.constant dense<0.000000e+00> : vector<1xf32>
      %67 = vector.multi_reduction <add>, %66, %cst_39 [1, 2] : vector<1x8x1xf32> to vector<1xf32>
      %68 = vector.shape_cast %67 : vector<1xf32> to vector<1x1x1xf32>
      %69 = vector.extract %68[0, 0, 0] : f32 from vector<1x1x1xf32>
      %c0_40 = arith.constant 0 : index
      %c0_41 = arith.constant 0 : index
      %70 = memref.load %arg6[%c0_40, %c0_41] : memref<1x1xf32, #tpu.memory_space<smem>>
      memref.store %69, %arg6[%c0_40, %c0_41] : memref<1x1xf32, #tpu.memory_space<smem>>
      %cst_42 = arith.constant dense<0.000000e+00> : vector<32xf32>
      %71 = vector.multi_reduction <add>, %3, %cst_42 [0] : vector<8x32xf32> to vector<32xf32>
      %72 = vector.shape_cast %71 : vector<32xf32> to vector<1x32xf32>
      %c0_43 = arith.constant 0 : index
      %c0_44 = arith.constant 0 : index
      %73 = vector.load %arg7[%c0_43, %c0_44] : memref<1x32xf32, #tpu.memory_space<vmem>>, vector<1x32xf32>
      tpu.vector_store %arg7[%c0_43, %c0_44], %72 {strides = array<i32>} : memref<1x32xf32, #tpu.memory_space<vmem>>, vector<1x32xf32>,
      %74 = arith.mulf %3, %3 : vector<8x32xf32>
      %75 = vector.shape_cast %74 : vector<8x32xf32> to vector<1x8x32xf32>
      %cst_45 = arith.constant dense<0.000000e+00> : vector<1xf32>
      %76 = vector.multi_reduction <add>, %75, %cst_45 [1, 2] : vector<1x8x32xf32> to vector<1xf32>
      %77 = vector.shape_cast %76 : vector<1xf32> to vector<1x1x1xf32>
      %78 = vector.extract %77[0, 0, 0] : f32 from vector<1x1x1xf32>
      %c0_46 = arith.constant 0 : index
      %c0_47 = arith.constant 0 : index
      %79 = memref.load %arg8[%c0_46, %c0_47] : memref<1x1xf32, #tpu.memory_space<smem>>
      memref.store %78, %arg8[%c0_46, %c0_47] : memref<1x1xf32, #tpu.memory_space<smem>>
    } else {
    }
    return
  }
  func.func @transform_0(%arg0: i32, %arg1: i32) -> (i32, i32) {
    %c0_i32 = arith.constant 0 : i32
    %c0_i32_0 = arith.constant 0 : i32
    return %arg0, %c0_i32 : i32, i32
  }
  func.func @transform_1(%arg0: i32, %arg1: i32) -> (i32, i32) {
    %c0_i32 = arith.constant 0 : i32
    %c0_i32_0 = arith.constant 0 : i32
    return %c0_i32, %arg1 : i32, i32
  }
  func.func @transform_2(%arg0: i32, %arg1: i32) -> (i32, i32) {
    %c0_i32 = arith.constant 0 : i32
    %c0_i32_0 = arith.constant 0 : i32
    return %arg0, %c0_i32 : i32, i32
  }
  func.func @transform_3(%arg0: i32, %arg1: i32) -> (i32, i32) {
    %c0_i32 = arith.constant 0 : i32
    %c0_i32_0 = arith.constant 0 : i32
    return %arg0, %c0_i32 : i32, i32
  }
  func.func @transform_4(%arg0: i32, %arg1: i32) -> (i32, i32) {
    %c0_i32 = arith.constant 0 : i32
    %c0_i32_0 = arith.constant 0 : i32
    return %arg0, %c0_i32 : i32, i32
  }
  func.func @transform_5(%arg0: i32, %arg1: i32) -> (i32, i32) {
    %c0_i32 = arith.constant 0 : i32
    %c0_i32_0 = arith.constant 0 : i32
    return %arg0, %c0_i32 : i32, i32
  }
  func.func @transform_6(%arg0: i32, %arg1: i32) -> (i32, i32) {
    %c0_i32 = arith.constant 0 : i32
    %c0_i32_0 = arith.constant 0 : i32
    return %arg0, %c0_i32 : i32, i32
  }
}

</mosaic_0001>

<bundles_post_ra>
// kernel: tpu_custom_call.1
= control target key start
LH: loop header
LB: loop body
LE: loop exit
PB: predicated region body
PF: predicated region fallthrough
CT: control target
= control target key end

     0   :  { %12 = vsyncpa [#allocation6], 0  ;;  %s475_s0 = inlined_call_operand.hbm [shape: f32[8,32], index: 0, kind: input, shape index: {}]   ;;  %s476_s1 = inlined_call_operand.vmem [shape: bf16[32,128], index: 1, kind: input, shape index: {}]   ;;  %s477_s2 = inlined_call_operand.vmem [shape: f32[8,1], index: 2, kind: input, shape index: {}]   ;;  %s478_s3 = inlined_call_operand.vmem [shape: s32[8,1], index: 3, kind: input, shape index: {}]   ;;  %s479_s4 = inlined_call_operand.hbm [shape: f32[1,1], index: 4, kind: output, shape index: {0}]   ;;  %s480_s5 = inlined_call_operand.hbm [shape: f32[1,32], index: 5, kind: output, shape index: {1}]   ;;  %s481_s6 = inlined_call_operand.hbm [shape: f32[1,1], index: 6, kind: output, shape index: {2}]  }
   0x1   :  { %13 = vsyncpa [#allocation8], 0 }
   0x2   :  { %14 = vsyncpa [#allocation7], 0 }
   0x3   :  { %15 = vsyncpa [#allocation12], 0  ;;  %s353_s21 = smov [#allocation5]   ;;  %s281_s25 = scalar_lea.hbm %s475_s0, 128 }
   0x4   :  { %s22_s22 = sshll.u32 %s353_s21, 4  ;;  %p282_p0 = scmp.ne.s32.totalorder %s475_s0, %s281_s25  ;;  %s23_s22 = int_to_ptr.vmem [resolvable:$true] %s22_s22 }
   0x5   :  { %p285_p1 = scmp.lt.u32.totalorder %s281_s25, %s475_s0 }
   0x7   :  { %p287_p2 = pnand %p285_p1, %p282_p0 }
   0x9   :  { %290 = shalt.err (!%p287_p2)
}
   0xa   :  { %s291_s30 = scalar_lea.vmem %s23_s22, 128  ;;  %p296_p4 = scmp.lt.s32.totalorder %s23_s22, %s23_s22 }
   0xb   :  { %p292_p3 = scmp.ne.s32.totalorder %s23_s22, %s291_s30  ;;  %p297_p5 = scmp.lt.s32.totalorder %s291_s30, %s291_s30 }
   0xd   :  { %p298_p6 = por %p297_p5, %p296_p4 }
   0xf   :  { %p299_p7 = pnand %p298_p6, %p292_p3 }
  0x11   :  { %302 = shalt.err (!%p299_p7)
}
  0x12   :  { %25 = dma.hbm_to_vmem [thread:$0]  %s475_s0, 128, %s23_s22, [#allocation6]  }
  0x13   :  { %345 = dma.done.wait [#allocation6], 128  }
  0x14   :  { %346 = vsyncadd [#allocation6], 4294967168  ;;  %vm40_vm0 = vcmask 7168   ;;  %v354_v0 = vmov 0.0   ;;  %vm355_vm1 = vmmov 0   ;;  %v356_v1 = vmov 0  }
  0x15   :  { %42 = vst.msk [vmem:[#allocation3] sm:$0xff] %vm40_vm0, %v354_v0  ;;  %43 = vst.msk [vmem:[#allocation4] sm:$0xff] %vm40_vm0, %v354_v0  ;;  %249 = vmatprep.subr.bf16.mxu0 %v354_v0  ;;  %253 = vmatprep.mubr.msk.bf16.mxu0 %vm355_vm1, %v354_v0  ;;  %v273_v2 = vld [vmem:[%s476_s1] sm:$0xff]   ;;  %v274_v3 = vld [vmem:[%s476_s1 + $0x8] sm:$0xff]   ;;  %vm62_vm3 = vcmask 261120   ;;  %v107_v12 = vlaneseq  ;;  %vm188_vm6 = vcmask 253952  }
  0x16   :  { %272 = vset.pattern.permute.xlu1 %v356_v1  ;;  %271 = vset.pattern.permute.xlu0 %v356_v1  ;;  %v416_v4 = vld [vmem:[#allocation5] sm:$0xff]  ;;  %v113_v5 = vld [vmem:[%s477_s2] sm:$0xff]  ;;  %v357_v11 = vmov -1e+30   ;;  %s358_s1 = smov [#allocation10]  }
  0x17   :  { %250 = vmatpush3.bf16.msra.mxu0 %v273_v2  ;;  %v114_v6 = vld [vmem:[%s478_s3] sm:$0xff]  ;;  %v45_v8 = vpack.c.bf16 %v416_v4, %v416_v4  ;;  %41 = vst.msk [vmem:[#allocation2] sm:$0xff] %vm40_vm0, %v357_v11  ;;  %v108_v13 = vand.u32 127, %v107_v12  ;;  %v190_v30 = vmul.f32 %v416_v4, %v416_v4  ;;  %v181_v49 = vsel %vm62_vm3, %v416_v4, 0.0  ;;  %s217_s2 = sshll.u32 %s358_s1, 4  ;;  %s218_s2 = int_to_ptr.vmem [resolvable:$true] %s217_s2 }
  0x18   :  { %251 = vmatprep.subr.bf16.mxu0 %v354_v0  ;;  %vm115_vm2 = vcmp.eq.s32.totalorder %v114_v6, 0  ;;  %v182_v50 = vrot.slane %v181_v49, 4  ;;  %s303_s3 = scalar_lea.vmem %s218_s2, 16  ;;  %s307_s16 = scalar_lea.vmem %s218_s2, 32 }
  0x19   :  { %v116_v7 = vsel %vm115_vm2, 0.0, %v113_v5  ;;  %vm111_vm5 = vcmp.lt.s32.totalorder %v108_v13, 8  ;;  %v191_v31 = vsel %vm62_vm3, %v190_v30, 0.0  ;;  %p304_p8 = scmp.ne.s32.totalorder %s218_s2, %s303_s3  ;;  %p308_p9 = scmp.lt.s32.totalorder %s218_s2, %s218_s2 }
  0x1a   :  { %v257_v9 = vtrunc.f32 %v116_v7  ;;  %v183_v51 = vadd.f32 %v182_v50, %v181_v49  ;;  %p309_p10 = scmp.lt.s32.totalorder %s307_s16, %s303_s3 }
  0x1b   :  { %252 = vmatpush3.bf16.msra.mxu0 %v274_v3 }
  0x1c   :  { %v258_v10 = vcvt.f32.s32 %v257_v9  ;;  %v134_v34 = vld [vmem:[#allocation3] sm:$0xff]  ;;  %v142_v38 = vld [vmem:[#allocation4] sm:$0xff]  ;;  %v184_v52 = vrot.slane %v183_v51, 2  ;;  %p310_p11 = por %p309_p10, %p308_p9 }
  0x1e   :  { %254 = vmatmul.mubr.msk.bf16.vlgmr.msra.gmra.mrb[0].mxu0 %vm62_vm3, %v45_v8  ;;  %144 = vperm.xlu1 %272, %v258_v10   ;;  %v118_v21 = vld [vmem:[#allocation2] sm:$0xff]  ;;  %v185_v53 = vadd.f32 %v184_v52, %v183_v51  ;;  %p311_p12 = pnand %p310_p11, %p304_p8 }
  0x20   :  { %v186_v54 = vrot.slane %v185_v53, 1 }
  0x22   :  { %v187_v55 = vadd.f32 %v186_v54, %v185_v53 }
  0x24   :  { %189 = vst.msk [vmem:[#allocation10] sm:$0x1] %vm188_vm6, %v187_v55 }
  0x9d   :  { %v145_v14 = vpop.permute.xlu1 %144 }
  0x9e   :  { %vm146_vm4 = vcmp.eq.s32.totalorder %v108_v13, %v145_v14 }
  0xf1   :  { %v100_v15 = vpop.f32.mrb[0].mxu0 }
  0xf2   :  { %v255_v16 = vpop.f32.mrb[1].mxu0  ;;  %v112_v17 = vsel %vm111_vm5, %v100_v15, -1e+30  ;;  %v147_v18 = vsel %vm146_vm4, %v100_v15, 0.0 }
  0xf3   :  { %119 = vmax.xlane.f32.xlu0 %v112_v17  ;;  %v103_v19 = vpop.f32.mrb[2].mxu0 }
  0xf4   :  { %v256_v20 = vpop.f32.mrb[3].mxu0 }
 0x180   :  { %v120_v22 = vpop.xlane.xlu0 %119 }
 0x181   :  { %v121_v23 = vmax.f32 %v118_v21, %v120_v22 }
 0x183   :  { %v122_v24 = vsub.f32 %v118_v21, %v121_v23  ;;  %141 = vst.msk [vmem:[#allocation2] sm:$0xff] %vm40_vm0, %v121_v23  ;;  %127 = vperm.xlu0 %271, %v121_v23  }
 0x185   :  { %v123_v32 = vmul.f32 1.442695, %v122_v24 }
 0x18a   :  { %v161_v44 = vld [vmem:[#allocation2] sm:$0xff] }
 0x1a2   :  { %192 = vadd.xlane.f32.xlu0 %v191_v31 }
 0x202   :  { %v128_v25 = vpop.permute.xlu0 %127 }
 0x203   :  { %v130_v26 = vsub.f32 %v112_v17, %v128_v25 }
 0x205   :  { %v131_v27 = vmul.f32 1.442695, %v130_v26 }
 0x207   :  { %275 = vpow2.f32 %v131_v27 }
 0x208   :  { %277 = vpow2.f32 %v123_v32 }
 0x211   :  { %v276_v28 = vpop.eup %275 }
 0x212   :  { %v133_v29 = vsel %vm111_vm5, %v276_v28, 0.0  ;;  %v278_v33 = vpop.eup %277 }
 0x213   :  { %136 = vadd.xlane.f32.xlu1 %v133_v29  ;;  %v135_v35 = vmul.f32 %v278_v33, %v134_v34 }
 0x217   :  { %148 = vadd.xlane.f32.xlu1 %v147_v18 }
 0x2a0   :  { %v137_v36 = vpop.xlane.xlu1 %136 }
 0x2a1   :  { %v138_v37 = vadd.f32 %v137_v36, %v135_v35 }
 0x2a3   :  { %140 = vst.msk [vmem:[#allocation3] sm:$0xff] %vm40_vm0, %v138_v37 }
 0x2a4   :  { %v149_v39 = vpop.xlane.xlu1 %148 }
 0x2a5   :  { %v150_v40 = vadd.f32 %v149_v39, %v142_v38 }
 0x2a7   :  { %151 = vst.msk [vmem:[#allocation4] sm:$0xff] %vm40_vm0, %v150_v40 }
 0x2aa   :  { %v162_v41 = vld [vmem:[#allocation3] sm:$0xff] }
 0x2ab   :  { %279 = vlog2.f32 %v162_v41 }
 0x2ae   :  { %v166_v46 = vld [vmem:[#allocation4] sm:$0xff] }
 0x2b5   :  { %v280_v42 = vpop.eup %279 }
 0x2b6   :  { %v164_v43 = vmul.f32 0.6931472, %v280_v42 }
 0x2b8   :  { %v165_v45 = vadd.f32 %v164_v43, %v161_v44 }
 0x2ba   :  { %v167_v47 = vsub.f32 %v165_v45, %v166_v46 }
 0x2bc   :  { %v169_v48 = vsel %vm40_vm0, %v167_v47, 0.0 }
 0x2bd   :  { %170 = vadd.xlane.f32.xlu1 %v169_v48 }
 0x2be   :  { %314 = shalt.err (!%p311_p12)
}
 0x2bf   :  { %s315_s19 = scalar_lea.hbm %s480_s5, 16 }
 0x2c0   :  { %p316_p13 = scmp.ne.s32.totalorder %s480_s5, %s315_s19  ;;  %p319_p0 = scmp.lt.u32.totalorder %s315_s19, %s480_s5 }
 0x2c2   :  { %p321_p1 = pnand %p319_p0, %p316_p13 }
 0x2c4   :  { %324 = shalt.err (!%p321_p1)
}
 0x2c5   :  { %220 = dma.vmem_to_hbm [thread:$0]  %s218_s2, 16, %s480_s5, [#allocation7]   ;;  %v193_v56 = vpop.xlane.xlu0 %192 }
 0x2c6   :  { %v194_v57 = vrot.slane %v193_v56, 4  ;;  %s325_s29 = scalar_lea.hbm %s479_s4, 16 }
 0x2c7   :  { %p326_p2 = scmp.ne.s32.totalorder %s479_s4, %s325_s29  ;;  %p329_p3 = scmp.lt.u32.totalorder %s325_s29, %s479_s4 }
 0x2c8   :  { %v195_v58 = vadd.f32 %v194_v57, %v193_v56 }
 0x2c9   :  { %p331_p4 = pnand %p329_p3, %p326_p2 }
 0x2ca   :  { %v196_v59 = vrot.slane %v195_v58, 2 }
 0x2cc   :  { %v197_v63 = vadd.f32 %v196_v59, %v195_v58 }
 0x2ce   :  { %v198_v2 = vrot.slane %v197_v63, 1 }
 0x2d0   :  { %v199_v5 = vadd.f32 %v198_v2, %v197_v63 }
 0x34a   :  { %v171_v60 = vpop.xlane.xlu1 %170 }
 0x34b   :  { %v172_v61 = vrot.slane %v171_v60, 4 }
 0x34d   :  { %v173_v62 = vadd.f32 %v172_v61, %v171_v60 }
 0x34f   :  { %v174_v0 = vrot.slane %v173_v62, 2 }
 0x351   :  { %v175_v1 = vadd.f32 %v174_v0, %v173_v62 }
 0x353   :  { %v176_v3 = vrot.slane %v175_v1, 1 }
 0x355   :  { %v177_v4 = vadd.f32 %v176_v3, %v175_v1 }
 0x357   :  { %259 = vpush %v177_v4 }
 0x358   :  { %261 = vpush %v199_v5 }
 0x388   :  { %s260_s26 = spop %259 }
 0x389   :  { %180 = sst [smem:[#allocation9]] %s260_s26  ;;  %s262_s27 = spop %261 }
 0x38a   :  { %202 = sst [smem:[#allocation11]] %s262_s27 }
 0x38b   :  { %334 = shalt.err (!%p331_p4)
}
 0x38c   :  { %s359_s10 = smov [#allocation9]   ;;  %s335_s14 = scalar_lea.hbm %s481_s6, 16 }
 0x38d   :  { %210 = dma.smem_to_hbm %s359_s10, 16, %s479_s4, [#allocation8]  }
 0x38e   :  { %p336_p5 = scmp.ne.s32.totalorder %s481_s6, %s335_s14  ;;  %p339_p6 = scmp.lt.u32.totalorder %s335_s14, %s481_s6 }
 0x390   :  { %p341_p7 = pnand %p339_p6, %p336_p5 }
 0x392   :  { %344 = shalt.err (!%p341_p7)
}
 0x393   :  { %s360_s16 = smov [#allocation11]  }
 0x394   :  { %228 = dma.smem_to_hbm %s360_s16, 16, %s481_s6, [#allocation12]  }
 0x395   :  { %347 = dma.done.wait [#allocation8], 16  }
 0x396   :  { %348 = vsyncadd [#allocation8], 4294967280 }
 0x397   :  { %349 = dma.done.wait [#allocation7], 16  }
 0x398   :  { %350 = vsyncadd [#allocation7], 4294967280 }
 0x399   :  { %351 = dma.done.wait [#allocation12], 16  }
 0x39a   :  { %352 = vsyncadd [#allocation12], 4294967280 }
 0x39b   :  { %238 = sfence }
 0x39c   :  { %239 = vsyncpa [#allocation6], 1 }
 0x39d   :  { %240 = vsyncpa [#allocation7], 1 }
 0x39e   :  { %241 = vsyncpa [#allocation8], 1 }
 0x39f   :  { %242 = vsyncpa [#allocation12], 1 }

</bundles_post_ra>
